<compile_context>
chip_gen: v7x
topology: tpu7x:2x2x1
jax: 0.10.0
libtpu: 0.0.40
codegen_flags: <defaults>
</compile_context>

<pallas_src>
import math

import jax
import jax.numpy as jnp
from jax.experimental import pallas as pl
from jax.experimental.pallas import tpu as pltpu


def _attention_kernel(x_ref, w_ref, b_ref, out_ref):
    """One batch element per grid step.

    x_ref:   (1, S, F) float32
    w_ref:   (F, S)    float32
    b_ref:   (1, S)    float32
    out_ref: (1, 1, F) float32
    """
    S = w_ref.shape[1]

    x = x_ref[0]                                                   # (S, F)
    w = w_ref[...]                                                 # (F, S)
    bias = b_ref[...]                                              # (1, S)

    # Projection + bias:  eij[s, t] = sum_f x[s, f] * W[f, t] + b[t]
    eij = jnp.dot(x, w, preferred_element_type=jnp.float32) + bias  # (S, S)

    # softmax over torch dim=1 == rows (axis 0) of the per-batch (S, S) matrix.
    m = jnp.max(eij, axis=0, keepdims=True)                        # (1, S)
    p = jnp.exp(eij - m)                                           # (S, S)
    denom = jnp.sum(p, axis=0, keepdims=True)                      # (1, S)
    # approx=True would put this on the EUP approx path; kept exact so the
    # self-check against the f32 reference stays tight.
    inv = pl.reciprocal(denom, approx=False)                       # (1, S)

    # Column sums of a = p * inv: only this (1, S) vector feeds the output,
    # because sum over dim=1 of bmm(a, x) == colsum(a) @ x.
    c = denom * inv                                                # (1, S)

    # Move c from lanes to sublanes with an iota-select "transpose"
    # (broadcast + compare + select + lane reduce: all VPU, guaranteed
    # lowering), then do one weighted sublane reduce over x's rows instead
    # of a second MXU matmul.
    row_i = jax.lax.broadcasted_iota(jnp.int32, (S, S), 0)
    col_i = jax.lax.broadcasted_iota(jnp.int32, (S, S), 1)
    c_rows = jnp.sum(
        jnp.where(row_i == col_i, jnp.broadcast_to(c, (S, S)), 0.0),
        axis=1, keepdims=True)                                     # (S, 1)

    # out[b, f] = sum_t c[t] * x[b, t, f]   -- single lane-dense block store.
    out_ref[0] = jnp.sum(x * c_rows, axis=0, keepdims=True)        # (1, F)


def attention_forward(x, weight, bias=None):
    """Runs Attention.forward.  x: (B, S, F), weight: (F, S), bias: (S,)."""
    B, S, F = x.shape
    assert weight.shape == (F, S)

    xf = x.astype(jnp.float32)
    w = weight.astype(jnp.float32)
    if bias is None:
        b2d = jnp.zeros((1, S), jnp.float32)
    else:
        b2d = bias.reshape(1, S).astype(jnp.float32)

    out3 = pl.pallas_call(
        _attention_kernel,
        grid=(B,),
        in_specs=[
            pl.BlockSpec((1, S, F), lambda i: (i, 0, 0)),   # per-batch x block
            pl.BlockSpec((F, S), lambda i: (0, 0)),         # shared weight
            pl.BlockSpec((1, S), lambda i: (0, 0)),         # shared bias
        ],
        out_specs=pl.BlockSpec((1, 1, F), lambda i: (i, 0, 0)),
        out_shape=jax.ShapeDtypeStruct((B, 1, F), jnp.float32),
        compiler_params=pltpu.CompilerParams(
            dimension_semantics=("parallel",)),              # megacore on v7x
    )(xf, w, b2d)
    # Free metadata reshape outside the kernel.
    return out3.reshape(B, F)


def attention_reference(x, weight, bias):
    """Pure-JAX mirror of the PyTorch forward, for the correctness check."""
    eij = jnp.einsum("bsf,ft->bst", x, weight)
    if bias is not None:
        eij = eij + bias
    a = jax.nn.softmax(eij, axis=1)
    return jnp.sum(jnp.einsum("bst,btf->bsf", a, x), axis=1)


if __name__ == "__main__":
    key = jax.random.PRNGKey(0)
    kx, kw, kb = jax.random.split(key, 3)

    BATCH = 2
    STEP_DIM = 8       # step_dim (sequence length)
    FEATURE_DIM = 32   # feature_dim

    x = jax.random.normal(kx, (BATCH, STEP_DIM, FEATURE_DIM), jnp.float32)

    # kaiming_uniform_ on a (feature_dim, step_dim) tensor: fan_in = step_dim
    bound = math.sqrt(6.0 / STEP_DIM)
    weight = jax.random.uniform(kw, (FEATURE_DIM, STEP_DIM), jnp.float32,
                                minval=-bound, maxval=bound)
    # The module zero-inits the bias; use small random values here so the
    # bias-add path in the kernel is actually exercised.
    bias = 0.1 * jax.random.normal(kb, (STEP_DIM,), jnp.float32)

    out = attention_forward(x, weight, bias)
    out = jax.block_until_ready(out)

    ref = attention_reference(x, weight, bias)
    assert out.shape == (BATCH, FEATURE_DIM)
    assert bool(jnp.all(jnp.isfinite(out)))
    assert bool(jnp.allclose(out, ref, rtol=1e-4, atol=1e-4))
    print("KERNEL_OK")
</pallas_src>

<mosaic_0001>
module attributes {stable_mosaic.version = 11 : i64} {
  func.func @_attention_kernel(%arg0: i32, %arg1: memref<1x8x32xf32, #tpu.memory_space<vmem>>, %arg2: memref<32x8xf32, #tpu.memory_space<vmem>>, %arg3: memref<1x8xf32, #tpu.memory_space<vmem>>, %arg4: memref<1x1x32xf32, #tpu.memory_space<vmem>>) attributes {dimension_semantics = [#tpu.dimension_semantics<parallel>], iteration_bounds = array<i64: 2>, scalar_prefetch = 0 : i64, scratch_operands = 0 : i64, tpu.core_type = #tpu.core_type<tc>, window_params = [{transform_indices = @transform_0, window_bounds = array<i64: 1, 8, 32>}, {pipeline_mode = #tpu.pipeline_mode<synchronous>, transform_indices = @transform_1, window_bounds = array<i64: 32, 8>}, {pipeline_mode = #tpu.pipeline_mode<synchronous>, transform_indices = @transform_2, window_bounds = array<i64: 1, 8>}, {transform_indices = @transform_3, window_bounds = array<i64: 1, 1, 32>}]} {
    %c0 = arith.constant 0 : index
    %c0_0 = arith.constant 0 : index
    %c0_1 = arith.constant 0 : index
    %0 = vector.load %arg1[%c0, %c0_0, %c0_1] : memref<1x8x32xf32, #tpu.memory_space<vmem>>, vector<1x8x32xf32>
    %1 = vector.shape_cast %0 : vector<1x8x32xf32> to vector<8x32xf32>
    %c0_2 = arith.constant 0 : index
    %c0_3 = arith.constant 0 : index
    %2 = vector.load %arg2[%c0_2, %c0_3] : memref<32x8xf32, #tpu.memory_space<vmem>>, vector<32x8xf32>
    %c0_4 = arith.constant 0 : index
    %c0_5 = arith.constant 0 : index
    %3 = vector.load %arg3[%c0_4, %c0_5] : memref<1x8xf32, #tpu.memory_space<vmem>>, vector<1x8xf32>
    %cst = arith.constant dense<0.000000e+00> : vector<8x8xf32>
    %4 = tpu.matmul %1, %2, %cst {dimension_numbers = #tpu.dot_dimension_numbers<[1], [0], [0], [1], [0, 0, 1, 1], [], []>} : vector<8x32xf32>, vector<32x8xf32>, vector<8x8xf32> -> vector<8x8xf32>
    %5 = vector.broadcast %3 : vector<1x8xf32> to vector<8x8xf32>
    %6 = arith.addf %4, %5 : vector<8x8xf32>
    %cst_6 = arith.constant dense<0xFF800000> : vector<8xf32>
    %7 = vector.multi_reduction <maximumf>, %6, %cst_6 [0] : vector<8x8xf32> to vector<8xf32>
    %8 = vector.shape_cast %7 : vector<8xf32> to vector<1x8xf32>
    %9 = vector.broadcast %8 : vector<1x8xf32> to vector<8x8xf32>
    %10 = arith.subf %6, %9 : vector<8x8xf32>
    %11 = math.exp %10 : vector<8x8xf32>
    %cst_7 = arith.constant dense<0.000000e+00> : vector<8xf32>
    %12 = vector.multi_reduction <add>, %11, %cst_7 [0] : vector<8x8xf32> to vector<8xf32>
    %13 = vector.shape_cast %12 : vector<8xf32> to vector<1x8xf32>
    %14 = tpu.reciprocal %13 : vector<1x8xf32> -> vector<1x8xf32>
    %15 = arith.mulf %13, %14 : vector<1x8xf32>
    %16 = tpu.iota {dimensions = array<i32: 0>} : vector<8x8xi32>
    %17 = tpu.iota {dimensions = array<i32: 1>} : vector<8x8xi32>
    %18 = arith.cmpi eq, %16, %17 : vector<8x8xi32>
    %19 = vector.shape_cast %15 : vector<1x8xf32> to vector<1x8xf32>
    %20 = vector.broadcast %19 : vector<1x8xf32> to vector<8x8xf32>
    %cst_8 = arith.constant 0.000000e+00 : f32
    %21 = vector.broadcast %cst_8 : f32 to vector<8x8xf32>
    %22 = arith.select %18, %20, %21 : vector<8x8xi1>, vector<8x8xf32>
    %cst_9 = arith.constant dense<0.000000e+00> : vector<8xf32>
    %23 = vector.multi_reduction <add>, %22, %cst_9 [1] : vector<8x8xf32> to vector<8xf32>
    %24 = vector.shape_cast %23 : vector<8xf32> to vector<8x1xf32>
    %25 = vector.broadcast %24 : vector<8x1xf32> to vector<8x32xf32>
    %26 = arith.mulf %1, %25 : vector<8x32xf32>
    %cst_10 = arith.constant dense<0.000000e+00> : vector<32xf32>
    %27 = vector.multi_reduction <add>, %26, %cst_10 [0] : vector<8x32xf32> to vector<32xf32>
    %28 = vector.shape_cast %27 : vector<32xf32> to vector<1x32xf32>
    %c0_11 = arith.constant 0 : index
    %c0_12 = arith.constant 0 : index
    %c0_13 = arith.constant 0 : index
    %29 = vector.load %arg4[%c0_11, %c0_12, %c0_13] : memref<1x1x32xf32, #tpu.memory_space<vmem>>, vector<1x1x32xf32>
    %30 = vector.shape_cast %29 : vector<1x1x32xf32> to vector<1x32xf32>
    %31 = vector.shape_cast %28 : vector<1x32xf32> to vector<1x1x32xf32>
    tpu.vector_store %arg4[%c0_11, %c0_12, %c0_13], %31 {strides = array<i32>} : memref<1x1x32xf32, #tpu.memory_space<vmem>>, vector<1x1x32xf32>,
    return
  }
  func.func @transform_0(%arg0: i32) -> (i32, i32, i32) {
    %c0_i32 = arith.constant 0 : i32
    %c0_i32_0 = arith.constant 0 : i32
    %c0_i32_1 = arith.constant 0 : i32
    return %arg0, %c0_i32, %c0_i32_0 : i32, i32, i32
  }
  func.func @transform_1(%arg0: i32) -> (i32, i32) {
    %c0_i32 = arith.constant 0 : i32
    %c0_i32_0 = arith.constant 0 : i32
    %c0_i32_1 = arith.constant 0 : i32
    return %c0_i32, %c0_i32_0 : i32, i32
  }
  func.func @transform_2(%arg0: i32) -> (i32, i32) {
    %c0_i32 = arith.constant 0 : i32
    %c0_i32_0 = arith.constant 0 : i32
    %c0_i32_1 = arith.constant 0 : i32
    return %c0_i32, %c0_i32_0 : i32, i32
  }
  func.func @transform_3(%arg0: i32) -> (i32, i32, i32) {
    %c0_i32 = arith.constant 0 : i32
    %c0_i32_0 = arith.constant 0 : i32
    %c0_i32_1 = arith.constant 0 : i32
    return %arg0, %c0_i32, %c0_i32_0 : i32, i32, i32
  }
}

</mosaic_0001>

<bundles_post_ra>
// kernel: tpu_custom_call.1
= control target key start
LH: loop header
LB: loop body
LE: loop exit
PB: predicated region body
PF: predicated region fallthrough
CT: control target
= control target key end

     0   :  { %8 = vsyncpa [#allocation3], 0  ;;  %s644_s0 = inlined_call_operand.vmem [shape: f32[2,8,32], index: 0, kind: input, shape index: {}]   ;;  %s645_s1 = inlined_call_operand.vmem [shape: f32[32,8], index: 1, kind: input, shape index: {}]   ;;  %s646_s2 = inlined_call_operand.vmem [shape: f32[1,8], index: 2, kind: input, shape index: {}]   ;;  %s647_s3 = inlined_call_operand.hbm [shape: f32[2,1,32], index: 3, kind: output, shape index: {}]  }
   0x1   :  { %10 = vsyncpa [#allocation3 + $0x1], 0  ;;  %s524_s12 = smov 0   ;;  %s526_s13 = smov 0  }
   0x2   :  { %s528_s14 = smov 0   ;;  %s530_s15 = smov 0  }
   0x3 LB: > { %s545_s16 = sadd.s32 4294967295, %s498_s15   ;;  %s358_s17 = sadd.s32 4294967294, %s498_s15   ;;  %s498_s15 = sphi %s530_s15, %s653_s15   ;;  %s494_s14 = sphi %s528_s14, %s652_s14   ;;  %s490_s13 = sphi %s526_s13, %s651_s13   ;;  %s486_s12 = sphi %s524_s12, %s650_s12  }
   0x4   : > { %s549_s18 = sadd.s32 1, %s498_s15   ;;  %s91_s19 = sadd.s32 1, %s494_s14 }
   0x5   : > { %s88_s20 = ssub.s32 %s498_s15, %s549_s18  ;;  %p101_p0 = scmp.ne.s32.totalorder %s494_s14, %s490_s13 }
   0x6   : > { %p89_p1 = scmp.eq.s32.totalorder %s88_s20, 0  ;;  %p102_p2 = scmp.eq.s32.totalorder %s545_s16, 1 }
   0x7   : > { %p107_p3 = scmp.ne.s32.totalorder %s490_s13, %s486_s12  ;;  %p108_p4 = scmp.eq.s32.totalorder %s358_s17, 1 }
   0x8   : > { %s560_s21 = scalar_select %p89_p1, %s494_s14, %s91_s19  }
   0x9   : > { %p562_p5 = por %p102_p2, %p101_p0  ;;  %p566_p6 = por %p108_p4, %p107_p3 }
   0xa   : > { %p361_p7 = scmp.ge.s32.totalorder %s498_s15, 1  ;;  %p139_p8 = scmp.lt.s32.totalorder %s498_s15, 3 }
   0xc   : > { %p140_p9 = pnand %p361_p7, %p139_p8 }
   0xd   : > { %v166_v0 = vld [vmem:[%s645_s1] sm:$0xff] (!%p140_p9)  ;;  %v167_v1 = vld [vmem:[%s645_s1 + $0x8] sm:$0xff] (!%p140_p9)  ;;  %v168_v2 = vld [vmem:[%s645_s1 + $0x10] sm:$0xff] (!%p140_p9)  ;;  %v500_v3 = vmov (!%p140_p9), 0.0|0.0   ;;  %vm501_vm0 = vmmov (!%p140_p9), 0   ;;  %v502_v6 = vmov (!%p140_p9), 0.0   ;;  %v271_v30 = vlaneseq (!%p140_p9) }
   0xe   : > { %143 = sbr.rel (%p140_p9) target bundleno = 467 (0x1d3), region = 32  ;;  %384 = vmatprep.subr.bf16.mxu0 (!%p140_p9), %v500_v3  ;;  %v385_v4 = vpack.c.bf16 (!%p140_p9), %v167_v1, %v166_v0  ;;  %v169_v5 = vld [vmem:[%s645_s1 + $0x18] sm:$0xff] (!%p140_p9)  ;;  %381 = vmatprep.mubr.msk.f32.mxu0 (!%p140_p9), %vm501_vm0, %v502_v6  ;;  %p161_p10 = scmp.lt.s32.totalorder (!%p140_p9), %s545_s16, 1  ;;  %vm177_vm1 = vcmask (!%p140_p9), 261120   ;;  %v363_v9 = vld [vmem:[%s646_s2] ss:$0 sm:$0xff] (!%p140_p9) }
   0xf   : > { %v388_v7 = vpack.c.bf16 (!%p140_p9), %v169_v5, %v168_v2  ;;  %vm251_vm2 = vcmask (!%p140_p9), 64512   ;;  %v272_v31 = vshrl.u32 (!%p140_p9), %v271_v30, 7  ;;  %v274_v32 = vand.u32 (!%p140_p9), 127, %v271_v30  ;;  %s159_s17 = sand.u32 (!%p140_p9), 1, %s490_s13   ;;  %s365_s19 = sshll.u32 (!%p140_p9), %s545_s16, 4 }
  0x10   : > { %386 = vmatpush3.bf16.msra.mxu0 (!%p140_p9), %v385_v4  ;;  %s160_s20 = scalar_lea.vmem (!%p140_p9), [#allocation2], %s159_s17  ;;  %vm288_vm4 = vcmask (!%p140_p9), 253952   ;;  %s602_s27 = scalar_lea.hbm (!%p140_p9), %s647_s3, %s365_s19 }
  0x11   : > { %387 = vmatprep.subr.bf16.mxu0 (!%p140_p9), %v500_v3  ;;  %vm275_vm3 = vcmp.eq.s32.totalorder (!%p140_p9), %v272_v31, %v274_v32  ;;  %s303_s24 = sshll.u32 (!%p140_p9), %s160_s20, 4  ;;  %s291_s28 = scalar_lea.sflag (!%p140_p9), [#allocation3], %s159_s17  ;;  %s604_s24 = int_to_ptr.vmem [resolvable:$true] %s303_s24 }
  0x12   : > { %s436_s29 = scalar_lea.vmem (!%p140_p9), %s604_s24, 16 }
  0x13   : > { %p437_p11 = scmp.ne.s32.totalorder (!%p140_p9), %s604_s24, %s436_s29 }
  0x14   : > { %389 = vmatpush3.bf16.msra.mxu0 (!%p140_p9), %v388_v7 }
  0x15   : > { %s162_s5 = scalar_select %p161_p10, %s545_s16, 1 }
  0x16   : > { %p438_p12 = pnand %p437_p11, %p562_p5  ;;  %s503_s16 = smov [#allocation2]  }
  0x17   : > { %s362_s6 = sshll.u32 %s162_s5, 3  ;;  %s440_s30 = sshll.u32 %s503_s16, 4  ;;  %s441_s30 = int_to_ptr.vmem [resolvable:$false] %s440_s30 }
  0x18   : > { %s164_s9 = scalar_lea.vmem %s644_s0, %s362_s6  ;;  %p439_p13 = pneg %p438_p12 }
  0x19   : > { %v165_v8 = vld [vmem:[%s164_s9] sm:$0xff]  ;;  %s442_s4 = scalar_lea.vmem %s441_s30, 32  ;;  %p443_p0 = scmp.lt.s32.totalorder %s604_s24, %s441_s30 }
  0x1a   : > { %382 = vmatmul.mubr.msk.f32.vlgmr.msra.gmra.mrb[0].mxu0 %vm177_vm1, %v165_v8  ;;  %p444_p1 = scmp.lt.s32.totalorder %s442_s4, %s436_s29 }
  0x1c   : > { %p445_p2 = por %p444_p1, %p443_p0 }
  0x1e   : > { %p446_p3 = pnand %p445_p2, %p439_p13 }
  0xed   : > { %v247_v10 = vpop.f32.mrb[0].mxu0 }
  0xee   : > { %v248_v11 = vadd.f32 %v363_v9, %v247_v10  ;;  %v383_v12 = vpop.f32.mrb[1].mxu0 }
  0xf0   : > { %v252_v13 = vsel %vm251_vm2, %v248_v11, -inf }
  0xf1   : > { %v253_v14 = vrot.slane %v252_v13, 4 }
  0xf3   : > { %v254_v15 = vmax.f32 %v252_v13, %v253_v14 }
  0xf5   : > { %v255_v16 = vrot.slane %v254_v15, 2 }
  0xf7   : > { %v256_v17 = vmax.f32 %v254_v15, %v255_v16 }
  0xf9   : > { %v257_v18 = vrot.slane %v256_v17, 1 }
  0xfb   : > { %v258_v19 = vmax.f32 %v256_v17, %v257_v18 }
  0xfd   : > { %v259_v20 = vsub.f32 %v248_v11, %v258_v19 }
  0xff   : > { %v260_v21 = vmul.f32 1.442695, %v259_v20 }
 0x101   : > { %432 = vpow2.f32 %v260_v21 }
 0x10b   : > { %v433_v22 = vpop.eup %432 }
 0x10c   : > { %v262_v23 = vsel %vm251_vm2, %v433_v22, 0.0 }
 0x10d   : > { %v263_v24 = vrot.slane %v262_v23, 4 }
 0x10f   : > { %v264_v25 = vadd.f32 %v263_v24, %v262_v23 }
 0x111   : > { %v265_v26 = vrot.slane %v264_v25, 2 }
 0x113   : > { %v266_v27 = vadd.f32 %v265_v26, %v264_v25 }
 0x115   : > { %v267_v28 = vrot.slane %v266_v27, 1 }
 0x117   : > { %v268_v29 = vadd.f32 %v267_v28, %v266_v27 }
 0x119   : > { %434 = vrcp.f32 %v268_v29 }
 0x123   : > { %v435_v33 = vpop.eup %434 }
 0x124   : > { %v270_v34 = vmul.f32 %v435_v33, %v268_v29 }
 0x126   : > { %v276_v35 = vsel %vm275_vm3, %v270_v34, 0.0 }
 0x127   : > { %v277_v36 = vsel %vm251_vm2, %v276_v35, 0.0 }
 0x128   : > { %278 = vadd.xlane.f32.xlu0 %v277_v36 }
 0x1b5   : > { %v279_v37 = vpop.xlane.xlu0 %278 }
 0x1b6   : > { %v280_v38 = vmul.f32 %v279_v37, %v165_v8 }
 0x1b8   : > { %v281_v39 = vsel %vm177_vm1, %v280_v38, 0.0 }
 0x1b9   : > { %v282_v40 = vrot.slane %v281_v39, 4 }
 0x1bb   : > { %v283_v41 = vadd.f32 %v282_v40, %v281_v39 }
 0x1bd   : > { %v284_v42 = vrot.slane %v283_v41, 2 }
 0x1bf   : > { %v285_v43 = vadd.f32 %v284_v42, %v283_v41 }
 0x1c1   : > { %v286_v44 = vrot.slane %v285_v43, 1 }
 0x1c3   : > { %v287_v45 = vadd.f32 %v286_v44, %v285_v43 }
 0x1c5   : > { %289 = vst.msk [vmem:[%s160_s20] sm:$0x1] %vm288_vm4, %v287_v45 }
 0x1c6   : > { %449 = shalt.err (!%p446_p3)
}
 0x1c7   : > { %s450_s5 = scalar_lea.hbm %s602_s27, 16  ;;  %s454_s8 = scalar_lea.hbm %s647_s3, 32 }
 0x1c8   : > { %p451_p4 = scmp.ne.s32.totalorder %s602_s27, %s450_s5  ;;  %p455_p9 = scmp.lt.u32.totalorder %s602_s27, %s647_s3 }
 0x1c9   : > { %p456_p10 = scmp.lt.u32.totalorder %s454_s8, %s450_s5  ;;  %p458_p12 = scmp.lt.u32.totalorder %s450_s5, %s602_s27 }
 0x1ca   : > { %p452_p7 = pnand %p451_p4, %p562_p5 }
 0x1cb   : > { %p457_p11 = por %p456_p10, %p455_p9 }
 0x1cc   : > { %p453_p8 = pneg %p452_p7 }
 0x1cd   : > { %p459_p13 = por %p458_p12, %p457_p11 }
 0x1cf   : > { %p460_p0 = pnand %p459_p13, %p453_p8 }
 0x1d1   : > { %463 = shalt.err (!%p460_p0)
}
 0x1d2   : > { %390 = dma.vmem_to_hbm [thread:$0]  (%p562_p5), %s604_s24, 16, %s602_s27, %s291_s28  }
 0x1d3 PF: > { %p396_p1 = scmp.ge.s32.totalorder %s498_s15, 2  ;;  %s315_s11 = sand.u32 1, %s486_s12  }
 0x1d4   : > { %s316_s17 = scalar_lea.sflag [#allocation3], %s315_s11 }
 0x1d5   : > { %p393_p2 = pnand %p396_p1, %p566_p6 }
 0x1d7   : > { %481 = dma.done.wait (!%p393_p2), %s316_s17, 16  }
 0x1d8   : > { %483 = vsyncadd (!%p393_p2), %s316_s17, 4294967280  ;;  %p13_p3 = scmp.ge.s32.totalorder %s549_s18, 4   ;;  %s650_s12 = smov %s490_s13 }
 0x1d9   : > { %s651_s13 = smov %s494_s14  ;;  %s652_s14 = smov %s560_s21 }
 0x1da   : > { %s653_s15 = smov %s549_s18  ;;  %15 = sbr.rel (!%p13_p3) target bundleno = 3 (0x3), region = 67 }
 0x1e1   :  { %320 = vsyncpa [#allocation3], 1 }
 0x1e2   :  { %322 = vsyncpa [#allocation3 + $0x1], 1 }

</bundles_post_ra>
